<compile_context>
chip_gen: v7x
topology: tpu7x:2x2x1
jax: 0.10.0
libtpu: 0.0.40
codegen_flags: <defaults>
</compile_context>

<pallas_src>
import functools

import jax
import jax.numpy as jnp
from jax.experimental import pallas as pl
from jax.experimental.pallas import tpu as pltpu

LANE = 128


def _round_up(x, m):
    return (x + m - 1) // m * m


def mlp_kernel(x_ref, w1_ref, b1_ref, w2_ref, b2_ref,
               w3_ref, b3_ref, w4_ref, b4_ref, o_ref):
    """Fused (Linear+ReLU) x3 then Linear; all matmuls on the MXU, f32 accumulate."""
    wdt = w1_ref.dtype  # compute dtype fed to the MXU (f32 or bf16)

    x = x_ref[...]
    # Biases are f32 and the ReLU is done in f32 (VPU-friendly on all generations);
    # activations are cast back to the MXU compute dtype before the next dot.
    h = jnp.dot(x, w1_ref[...], preferred_element_type=jnp.float32) + b1_ref[...]
    h = jnp.maximum(h, 0.0).astype(wdt)
    h = jnp.dot(h, w2_ref[...], preferred_element_type=jnp.float32) + b2_ref[...]
    h = jnp.maximum(h, 0.0).astype(wdt)
    h = jnp.dot(h, w3_ref[...], preferred_element_type=jnp.float32) + b3_ref[...]
    h = jnp.maximum(h, 0.0).astype(wdt)
    o = jnp.dot(h, w4_ref[...], preferred_element_type=jnp.float32) + b4_ref[...]
    o_ref[...] = o.astype(o_ref.dtype)


@functools.partial(jax.jit, static_argnames=("tile_b", "compute_dtype"))
def mynn_forward(x, params, tile_b=128, compute_dtype="float32"):
    """Pallas forward pass of MyNN.

    x:      (B, input_dim) float32
    params: dict of w1,b1,...,w4,b4 with w_i shaped (in, out), b_i shaped (1, out)
    tile_b: batch tile per grid step (multiple of 8; 128+ recommended for big B)
    compute_dtype: "float32" (exact) or "bfloat16" (fast path on v6e/v7x;
                   f32 accumulation inside the MXU, f32 output).
    """
    B, d_in = x.shape
    d_out = params["w4"].shape[1]
    d_out_pad = _round_up(d_out, LANE)          # lane-dense output slab
    cdt = jnp.dtype(compute_dtype)

    # Cast MXU inputs to the compute dtype; keep biases (and ReLU math) in f32.
    xc = x.astype(cdt)
    w1 = params["w1"].astype(cdt)
    w2 = params["w2"].astype(cdt)
    w3 = params["w3"].astype(cdt)
    # Zero-pad the last layer to 128 output lanes: unmasked full-lane stores.
    w4 = jnp.pad(params["w4"], ((0, 0), (0, d_out_pad - d_out))).astype(cdt)
    b1 = params["b1"].astype(jnp.float32)
    b2 = params["b2"].astype(jnp.float32)
    b3 = params["b3"].astype(jnp.float32)
    b4 = jnp.pad(params["b4"], ((0, 0), (0, d_out_pad - d_out))).astype(jnp.float32)

    # No point in a batch tile larger than the (8-aligned) batch itself;
    # for the toy B=16 case this gives grid=(1,) and zero pipeline overhead.
    tile_b = max(8, min(tile_b, _round_up(B, 8)))
    grid = (pl.cdiv(B, tile_b),)

    # Weights/biases are small (~400 KB total): replicate full arrays each step.
    def rep(arr):
        return pl.BlockSpec(arr.shape, lambda i: (0, 0))

    in_specs = [
        pl.BlockSpec((tile_b, d_in), lambda i: (i, 0)),   # x tile over batch
        rep(w1), rep(b1), rep(w2), rep(b2), rep(w3), rep(b3), rep(w4), rep(b4),
    ]
    out_spec = pl.BlockSpec((tile_b, d_out_pad), lambda i: (i, 0))

    # Advisory cost hint for XLA's scheduler around this custom call.
    h1, h2, h3 = params["w1"].shape[1], params["w2"].shape[1], params["w3"].shape[1]
    flops = 2 * B * (d_in * h1 + h1 * h2 + h2 * h3 + h3 * d_out_pad)
    bytes_accessed = (
        xc.size * xc.dtype.itemsize
        + sum(a.size * a.dtype.itemsize
              for a in (w1, b1, w2, b2, w3, b3, w4, b4))
        + B * d_out_pad * jnp.dtype(x.dtype).itemsize)

    # NOTE: when B is not a multiple of tile_b, the last grid step reads padded
    # rows past the end of x; each output row depends only on its own input row
    # and the padded output rows are masked/sliced away, so this is harmless.
    # Do NOT add any cross-row reduction inside the kernel without revisiting this.
    out_pad = pl.pallas_call(
        mlp_kernel,
        out_shape=jax.ShapeDtypeStruct((B, d_out_pad), x.dtype),
        grid_spec=pl.GridSpec(grid=grid, in_specs=in_specs, out_specs=out_spec),
        compiler_params=pltpu.CompilerParams(
            dimension_semantics=("parallel",)),
        cost_estimate=pl.CostEstimate(
            flops=flops, transcendentals=0, bytes_accessed=bytes_accessed),
    )(xc, w1, b1, w2, b2, w3, b3, w4, b4)

    return out_pad[:, :d_out]


def init_params(key, input_dim, output_dim):
    """Deterministic init mimicking nn.Linear's U(-1/sqrt(fan_in), 1/sqrt(fan_in))."""
    dims = [(input_dim, 256), (256, 256), (256, 64), (64, output_dim)]
    params = {}
    for idx, (fan_in, fan_out) in enumerate(dims, start=1):
        key, kw, kb = jax.random.split(key, 3)
        bound = 1.0 / jnp.sqrt(float(fan_in))
        params[f"w{idx}"] = jax.random.uniform(
            kw, (fan_in, fan_out), jnp.float32, -bound, bound)
        params[f"b{idx}"] = jax.random.uniform(
            kb, (1, fan_out), jnp.float32, -bound, bound)
    return params


def mynn_reference(x, params):
    h = jnp.maximum(x @ params["w1"] + params["b1"], 0.0)
    h = jnp.maximum(h @ params["w2"] + params["b2"], 0.0)
    h = jnp.maximum(h @ params["w3"] + params["b3"], 0.0)
    return h @ params["w4"] + params["b4"]


if __name__ == "__main__":
    key = jax.random.PRNGKey(0)
    key, kx, kp = jax.random.split(key, 3)

    batch, input_dim, output_dim = 16, 32, 8
    x = jax.random.normal(kx, (batch, input_dim), jnp.float32)
    params = init_params(kp, input_dim, output_dim)
    ref = mynn_reference(x, params)

    # f32 path (exact): tile_b clamps to the batch -> grid=(1,).
    out = jax.block_until_ready(mynn_forward(x, params))
    assert out.shape == (batch, output_dim)
    assert jnp.allclose(out, ref, atol=1e-4, rtol=1e-4)

    # bf16 fast path (v6e/v7x): f32 accumulation, looser tolerance.
    out_bf16 = jax.block_until_ready(
        mynn_forward(x, params, compute_dtype="bfloat16"))
    assert out_bf16.shape == (batch, output_dim)
    assert jnp.allclose(out_bf16, ref, atol=1e-1, rtol=1e-1)

    print("KERNEL_OK")
</pallas_src>

<mosaic_0001>
module attributes {stable_mosaic.version = 11 : i64} {
  func.func @mlp_kernel(%arg0: i32, %arg1: memref<16x32xf32, #tpu.memory_space<vmem>>, %arg2: memref<32x256xf32, #tpu.memory_space<vmem>>, %arg3: memref<1x256xf32, #tpu.memory_space<vmem>>, %arg4: memref<256x256xf32, #tpu.memory_space<vmem>>, %arg5: memref<1x256xf32, #tpu.memory_space<vmem>>, %arg6: memref<256x64xf32, #tpu.memory_space<vmem>>, %arg7: memref<1x64xf32, #tpu.memory_space<vmem>>, %arg8: memref<64x128xf32, #tpu.memory_space<vmem>>, %arg9: memref<1x128xf32, #tpu.memory_space<vmem>>, %arg10: memref<16x128xf32, #tpu.memory_space<vmem>>) attributes {dimension_semantics = [#tpu.dimension_semantics<parallel>], iteration_bounds = array<i64: 1>, scalar_prefetch = 0 : i64, scratch_operands = 0 : i64, tpu.core_type = #tpu.core_type<tc>, window_params = [{transform_indices = @transform_0, window_bounds = array<i64: 16, 32>}, {pipeline_mode = #tpu.pipeline_mode<synchronous>, transform_indices = @transform_1, window_bounds = array<i64: 32, 256>}, {pipeline_mode = #tpu.pipeline_mode<synchronous>, transform_indices = @transform_2, window_bounds = array<i64: 1, 256>}, {pipeline_mode = #tpu.pipeline_mode<synchronous>, transform_indices = @transform_3, window_bounds = array<i64: 256, 256>}, {pipeline_mode = #tpu.pipeline_mode<synchronous>, transform_indices = @transform_4, window_bounds = array<i64: 1, 256>}, {pipeline_mode = #tpu.pipeline_mode<synchronous>, transform_indices = @transform_5, window_bounds = array<i64: 256, 64>}, {pipeline_mode = #tpu.pipeline_mode<synchronous>, transform_indices = @transform_6, window_bounds = array<i64: 1, 64>}, {pipeline_mode = #tpu.pipeline_mode<synchronous>, transform_indices = @transform_7, window_bounds = array<i64: 64, 128>}, {pipeline_mode = #tpu.pipeline_mode<synchronous>, transform_indices = @transform_8, window_bounds = array<i64: 1, 128>}, {transform_indices = @transform_9, window_bounds = array<i64: 16, 128>}]} {
    %c0 = arith.constant 0 : index
    %c0_0 = arith.constant 0 : index
    %0 = vector.load %arg1[%c0, %c0_0] : memref<16x32xf32, #tpu.memory_space<vmem>>, vector<16x32xf32>
    %c0_1 = arith.constant 0 : index
    %c0_2 = arith.constant 0 : index
    %1 = vector.load %arg2[%c0_1, %c0_2] : memref<32x256xf32, #tpu.memory_space<vmem>>, vector<32x256xf32>
    %cst = arith.constant dense<0.000000e+00> : vector<16x256xf32>
    %2 = tpu.matmul %0, %1, %cst {dimension_numbers = #tpu.dot_dimension_numbers<[1], [0], [0], [1], [0, 0, 1, 1], [], []>} : vector<16x32xf32>, vector<32x256xf32>, vector<16x256xf32> -> vector<16x256xf32>
    %c0_3 = arith.constant 0 : index
    %c0_4 = arith.constant 0 : index
    %3 = vector.load %arg3[%c0_3, %c0_4] : memref<1x256xf32, #tpu.memory_space<vmem>>, vector<1x256xf32>
    %4 = vector.broadcast %3 : vector<1x256xf32> to vector<16x256xf32>
    %5 = arith.addf %2, %4 : vector<16x256xf32>
    %cst_5 = arith.constant 0.000000e+00 : f32
    %6 = vector.broadcast %cst_5 : f32 to vector<16x256xf32>
    %7 = arith.maximumf %5, %6 : vector<16x256xf32>
    %c0_6 = arith.constant 0 : index
    %c0_7 = arith.constant 0 : index
    %8 = vector.load %arg4[%c0_6, %c0_7] : memref<256x256xf32, #tpu.memory_space<vmem>>, vector<256x256xf32>
    %cst_8 = arith.constant dense<0.000000e+00> : vector<16x256xf32>
    %9 = tpu.matmul %7, %8, %cst_8 {dimension_numbers = #tpu.dot_dimension_numbers<[1], [0], [0], [1], [0, 0, 1, 1], [], []>} : vector<16x256xf32>, vector<256x256xf32>, vector<16x256xf32> -> vector<16x256xf32>
    %c0_9 = arith.constant 0 : index
    %c0_10 = arith.constant 0 : index
    %10 = vector.load %arg5[%c0_9, %c0_10] : memref<1x256xf32, #tpu.memory_space<vmem>>, vector<1x256xf32>
    %11 = vector.broadcast %10 : vector<1x256xf32> to vector<16x256xf32>
    %12 = arith.addf %9, %11 : vector<16x256xf32>
    %cst_11 = arith.constant 0.000000e+00 : f32
    %13 = vector.broadcast %cst_11 : f32 to vector<16x256xf32>
    %14 = arith.maximumf %12, %13 : vector<16x256xf32>
    %c0_12 = arith.constant 0 : index
    %c0_13 = arith.constant 0 : index
    %15 = vector.load %arg6[%c0_12, %c0_13] : memref<256x64xf32, #tpu.memory_space<vmem>>, vector<256x64xf32>
    %cst_14 = arith.constant dense<0.000000e+00> : vector<16x64xf32>
    %16 = tpu.matmul %14, %15, %cst_14 {dimension_numbers = #tpu.dot_dimension_numbers<[1], [0], [0], [1], [0, 0, 1, 1], [], []>} : vector<16x256xf32>, vector<256x64xf32>, vector<16x64xf32> -> vector<16x64xf32>
    %c0_15 = arith.constant 0 : index
    %c0_16 = arith.constant 0 : index
    %17 = vector.load %arg7[%c0_15, %c0_16] : memref<1x64xf32, #tpu.memory_space<vmem>>, vector<1x64xf32>
    %18 = vector.broadcast %17 : vector<1x64xf32> to vector<16x64xf32>
    %19 = arith.addf %16, %18 : vector<16x64xf32>
    %cst_17 = arith.constant 0.000000e+00 : f32
    %20 = vector.broadcast %cst_17 : f32 to vector<16x64xf32>
    %21 = arith.maximumf %19, %20 : vector<16x64xf32>
    %c0_18 = arith.constant 0 : index
    %c0_19 = arith.constant 0 : index
    %22 = vector.load %arg8[%c0_18, %c0_19] : memref<64x128xf32, #tpu.memory_space<vmem>>, vector<64x128xf32>
    %cst_20 = arith.constant dense<0.000000e+00> : vector<16x128xf32>
    %23 = tpu.matmul %21, %22, %cst_20 {dimension_numbers = #tpu.dot_dimension_numbers<[1], [0], [0], [1], [0, 0, 1, 1], [], []>} : vector<16x64xf32>, vector<64x128xf32>, vector<16x128xf32> -> vector<16x128xf32>
    %c0_21 = arith.constant 0 : index
    %c0_22 = arith.constant 0 : index
    %24 = vector.load %arg9[%c0_21, %c0_22] : memref<1x128xf32, #tpu.memory_space<vmem>>, vector<1x128xf32>
    %25 = vector.broadcast %24 : vector<1x128xf32> to vector<16x128xf32>
    %26 = arith.addf %23, %25 : vector<16x128xf32>
    %c0_23 = arith.constant 0 : index
    %c0_24 = arith.constant 0 : index
    %27 = vector.load %arg10[%c0_23, %c0_24] : memref<16x128xf32, #tpu.memory_space<vmem>>, vector<16x128xf32>
    tpu.vector_store %arg10[%c0_23, %c0_24], %26 {strides = array<i32>} : memref<16x128xf32, #tpu.memory_space<vmem>>, vector<16x128xf32>,
    return
  }
  func.func @transform_0(%arg0: i32) -> (i32, i32) {
    %c0_i32 = arith.constant 0 : i32
    %c0_i32_0 = arith.constant 0 : i32
    return %arg0, %c0_i32 : i32, i32
  }
  func.func @transform_1(%arg0: i32) -> (i32, i32) {
    %c0_i32 = arith.constant 0 : i32
    %c0_i32_0 = arith.constant 0 : i32
    %c0_i32_1 = arith.constant 0 : i32
    return %c0_i32, %c0_i32_0 : i32, i32
  }
  func.func @transform_2(%arg0: i32) -> (i32, i32) {
    %c0_i32 = arith.constant 0 : i32
    %c0_i32_0 = arith.constant 0 : i32
    %c0_i32_1 = arith.constant 0 : i32
    return %c0_i32, %c0_i32_0 : i32, i32
  }
  func.func @transform_3(%arg0: i32) -> (i32, i32) {
    %c0_i32 = arith.constant 0 : i32
    %c0_i32_0 = arith.constant 0 : i32
    %c0_i32_1 = arith.constant 0 : i32
    return %c0_i32, %c0_i32_0 : i32, i32
  }
  func.func @transform_4(%arg0: i32) -> (i32, i32) {
    %c0_i32 = arith.constant 0 : i32
    %c0_i32_0 = arith.constant 0 : i32
    %c0_i32_1 = arith.constant 0 : i32
    return %c0_i32, %c0_i32_0 : i32, i32
  }
  func.func @transform_5(%arg0: i32) -> (i32, i32) {
    %c0_i32 = arith.constant 0 : i32
    %c0_i32_0 = arith.constant 0 : i32
    %c0_i32_1 = arith.constant 0 : i32
    return %c0_i32, %c0_i32_0 : i32, i32
  }
  func.func @transform_6(%arg0: i32) -> (i32, i32) {
    %c0_i32 = arith.constant 0 : i32
    %c0_i32_0 = arith.constant 0 : i32
    %c0_i32_1 = arith.constant 0 : i32
    return %c0_i32, %c0_i32_0 : i32, i32
  }
  func.func @transform_7(%arg0: i32) -> (i32, i32) {
    %c0_i32 = arith.constant 0 : i32
    %c0_i32_0 = arith.constant 0 : i32
    %c0_i32_1 = arith.constant 0 : i32
    return %c0_i32, %c0_i32_0 : i32, i32
  }
  func.func @transform_8(%arg0: i32) -> (i32, i32) {
    %c0_i32 = arith.constant 0 : i32
    %c0_i32_0 = arith.constant 0 : i32
    %c0_i32_1 = arith.constant 0 : i32
    return %c0_i32, %c0_i32_0 : i32, i32
  }
  func.func @transform_9(%arg0: i32) -> (i32, i32) {
    %c0_i32 = arith.constant 0 : i32
    %c0_i32_0 = arith.constant 0 : i32
    return %arg0, %c0_i32 : i32, i32
  }
}

</mosaic_0001>

<bundles_post_ra>
// kernel: mynn_forward.1
= control target key start
LH: loop header
LB: loop body
LE: loop exit
PB: predicated region body
PF: predicated region fallthrough
CT: control target
= control target key end

     0   :  { %v712_v3 = vmov 0.0   ;;  %vm54_vm0 = vcmask 261120   ;;  %vm430_vm1 = vcmask 523264   ;;  %s1125_s1 = inlined_call_operand.vmem [shape: f32[32,256], index: 1, kind: input, shape index: {}]   ;;  %s1126_s3 = inlined_call_operand.vmem [shape: f32[256,256], index: 3, kind: input, shape index: {}]   ;;  %s1127_s0 = inlined_call_operand.vmem [shape: f32[16,32], index: 0, kind: input, shape index: {}]   ;;  %s1128_s5 = inlined_call_operand.vmem [shape: f32[256,64], index: 5, kind: input, shape index: {}]   ;;  %s1129_s2 = inlined_call_operand.vmem [shape: f32[1,256], index: 2, kind: input, shape index: {}]   ;;  %s1130_s7 = inlined_call_operand.vmem [shape: f32[64,128], index: 7, kind: input, shape index: {}]   ;;  %s1131_s4 = inlined_call_operand.vmem [shape: f32[1,256], index: 4, kind: input, shape index: {}]   ;;  %s1132_s6 = inlined_call_operand.vmem [shape: f32[1,64], index: 6, kind: input, shape index: {}]   ;;  %s1133_s8 = inlined_call_operand.vmem [shape: f32[1,128], index: 8, kind: input, shape index: {}]   ;;  %s1134_s9 = inlined_call_operand.vmem [shape: f32[16,128], index: 9, kind: output, shape index: {}]  }
   0x1   :  { %v35_v0 = vld [vmem:[%s1125_s1 + $0x8] sm:$0xff]  ;;  %v37_v1 = vld [vmem:[%s1125_s1 + $0x18] sm:$0xff]  ;;  %v34_v2 = vld [vmem:[%s1125_s1] sm:$0xff]  ;;  %125 = vmatprep.mubr.f32.mxu0 %v712_v3 }
   0x2   :  { %v591_v4 = vpack.c.bf16 %v37_v1, %v35_v0  ;;  %v36_v5 = vld [vmem:[%s1125_s1 + $0x10] sm:$0xff]  ;;  %v39_v6 = vld [vmem:[%s1125_s1 + $0x28] sm:$0xff]  ;;  %v41_v7 = vld [vmem:[%s1125_s1 + $0x38] sm:$0xff] }
   0x3   :  { %v593_v8 = vpack.c.bf16 %v36_v5, %v34_v2  ;;  %v595_v9 = vpack.c.bf16 %v41_v7, %v39_v6  ;;  %v38_v10 = vld [vmem:[%s1125_s1 + $0x20] sm:$0xff]  ;;  %v40_v11 = vld [vmem:[%s1125_s1 + $0x30] sm:$0xff]  ;;  %v143_v12 = vld [vmem:[%s1126_s3 + $0x8] sm:$0xff] }
   0x4   :  { %592 = vmatprep.subr.bf16.mxu0 %v591_v4  ;;  %v145_v13 = vld [vmem:[%s1126_s3 + $0x18] sm:$0xff]  ;;  %v597_v14 = vpack.c.bf16 %v40_v11, %v38_v10  ;;  %v142_v16 = vld [vmem:[%s1126_s3] sm:$0xff]  ;;  %v144_v17 = vld [vmem:[%s1126_s3 + $0x10] sm:$0xff] }
   0x5   :  { %594 = vmatpush1.bf16.msra.mxu0 %v593_v8  ;;  %v599_v15 = vpack.c.bf16 %v145_v13, %v143_v12  ;;  %v147_v18 = vld [vmem:[%s1126_s3 + $0x28] sm:$0xff]  ;;  %v601_v19 = vpack.c.bf16 %v144_v17, %v142_v16  ;;  %v149_v20 = vld [vmem:[%s1126_s3 + $0x38] sm:$0xff]  ;;  %v146_v21 = vld [vmem:[%s1126_s3 + $0x20] sm:$0xff] }
   0x6   :  { %596 = vmatprep.subr.bf16.mxu0 %v595_v9  ;;  %v148_v22 = vld [vmem:[%s1126_s3 + $0x30] sm:$0xff]  ;;  %v603_v23 = vpack.c.bf16 %v149_v20, %v147_v18  ;;  %v151_v24 = vld [vmem:[%s1126_s3 + $0x48] sm:$0xff]  ;;  %v153_v25 = vld [vmem:[%s1126_s3 + $0x58] sm:$0xff] }
   0x7   :  { %600 = vmatprep.subr.bf16.mxu1 %v599_v15  ;;  %v605_v26 = vpack.c.bf16 %v148_v22, %v146_v21  ;;  %v32_v27 = vld [vmem:[%s1127_s0] sm:$0xff]  ;;  %v607_v28 = vpack.c.bf16 %v153_v25, %v151_v24  ;;  %v152_v30 = vld [vmem:[%s1126_s3 + $0x50] sm:$0xff]  ;;  %v155_v31 = vld [vmem:[%s1126_s3 + $0x68] sm:$0xff] }
   0x8   :  { %602 = vmatpush1.bf16.msra.mxu1 %v601_v19  ;;  %v150_v29 = vld [vmem:[%s1126_s3 + $0x40] sm:$0xff]  ;;  %v157_v32 = vld [vmem:[%s1126_s3 + $0x78] sm:$0xff]  ;;  %v33_v34 = vld [vmem:[%s1127_s0 + $0x8] sm:$0xff] }
   0x9   :  { %598 = vmatpush1.bf16.msra.mxu0 %v597_v14  ;;  %604 = vmatprep.subr.bf16.mxu1 %v603_v23  ;;  %v609_v33 = vpack.c.bf16 %v152_v30, %v150_v29  ;;  %v611_v35 = vpack.c.bf16 %v157_v32, %v155_v31  ;;  %v154_v36 = vld [vmem:[%s1126_s3 + $0x60] sm:$0xff]  ;;  %v156_v37 = vld [vmem:[%s1126_s3 + $0x70] sm:$0xff]  ;;  %v159_v38 = vld [vmem:[%s1126_s3 + $0x88] sm:$0xff] }
   0xa   :  { %v161_v39 = vld [vmem:[%s1126_s3 + $0x98] sm:$0xff]  ;;  %v613_v40 = vpack.c.bf16 %v156_v37, %v154_v36  ;;  %v158_v42 = vld [vmem:[%s1126_s3 + $0x80] sm:$0xff]  ;;  %v160_v43 = vld [vmem:[%s1126_s3 + $0x90] sm:$0xff] }
   0xb   :  { %v615_v41 = vpack.c.bf16 %v161_v39, %v159_v38  ;;  %v163_v44 = vld [vmem:[%s1126_s3 + $0xa8] sm:$0xff]  ;;  %v165_v45 = vld [vmem:[%s1126_s3 + $0xb8] sm:$0xff]  ;;  %v617_v46 = vpack.c.bf16 %v160_v43, %v158_v42  ;;  %v162_v48 = vld [vmem:[%s1126_s3 + $0xa0] sm:$0xff] }
   0xc   :  { %518 = vmatmul.mubr.msk.f32.vlgmr.msra.gmra.mrb[0].mxu0 %vm54_vm0, %v32_v27  ;;  %606 = vmatpush1.bf16.msra.mxu1 %v605_v26  ;;  %v619_v47 = vpack.c.bf16 %v165_v45, %v163_v44  ;;  %v164_v49 = vld [vmem:[%s1126_s3 + $0xb0] sm:$0xff]  ;;  %v167_v50 = vld [vmem:[%s1126_s3 + $0xc8] sm:$0xff]  ;;  %v169_v51 = vld [vmem:[%s1126_s3 + $0xd8] sm:$0xff] }
   0xd   :  { %131 = vmatprep.mubr.f32.mxu0 %v712_v3  ;;  %608 = vmatprep.subr.bf16.mxu1 %v607_v28  ;;  %v621_v52 = vpack.c.bf16 %v164_v49, %v162_v48  ;;  %v623_v53 = vpack.c.bf16 %v169_v51, %v167_v50  ;;  %v166_v54 = vld [vmem:[%s1126_s3 + $0xc0] sm:$0xff]  ;;  %v168_v55 = vld [vmem:[%s1126_s3 + $0xd0] sm:$0xff]  ;;  %v171_v56 = vld [vmem:[%s1126_s3 + $0xe8] sm:$0xff] }
   0xe   :  { %v173_v57 = vld [vmem:[%s1126_s3 + $0xf8] sm:$0xff]  ;;  %v625_v58 = vpack.c.bf16 %v168_v55, %v166_v54  ;;  %v170_v60 = vld [vmem:[%s1126_s3 + $0xe0] sm:$0xff]  ;;  %v172_v61 = vld [vmem:[%s1126_s3 + $0xf0] sm:$0xff] }
   0xf   :  { %v627_v59 = vpack.c.bf16 %v173_v57, %v171_v56  ;;  %v175_v62 = vld [vmem:[%s1126_s3 + $0x108] sm:$0xff]  ;;  %v177_v63 = vld [vmem:[%s1126_s3 + $0x118] sm:$0xff]  ;;  %v629_v0 = vpack.c.bf16 %v172_v61, %v170_v60  ;;  %v174_v2 = vld [vmem:[%s1126_s3 + $0x100] sm:$0xff] }
  0x10   :  { %519 = vmatmul.mubr.msk.f32.gmra.mrb[2].mxu0 %vm54_vm0, %v33_v34  ;;  %610 = vmatpush1.bf16.msra.mxu1 %v609_v33  ;;  %v631_v1 = vpack.c.bf16 %v177_v63, %v175_v62  ;;  %v176_v3 = vld [vmem:[%s1126_s3 + $0x110] sm:$0xff]  ;;  %v179_v4 = vld [vmem:[%s1126_s3 + $0x128] sm:$0xff]  ;;  %v181_v5 = vld [vmem:[%s1126_s3 + $0x138] sm:$0xff] }
  0x11   :  { %612 = vmatprep.subr.bf16.mxu1 %v611_v35  ;;  %v633_v6 = vpack.c.bf16 %v176_v3, %v174_v2  ;;  %v635_v7 = vpack.c.bf16 %v181_v5, %v179_v4  ;;  %v178_v8 = vld [vmem:[%s1126_s3 + $0x120] sm:$0xff]  ;;  %v180_v9 = vld [vmem:[%s1126_s3 + $0x130] sm:$0xff]  ;;  %v183_v10 = vld [vmem:[%s1126_s3 + $0x148] sm:$0xff] }
  0x12   :  { %v185_v11 = vld [vmem:[%s1126_s3 + $0x158] sm:$0xff]  ;;  %v637_v12 = vpack.c.bf16 %v180_v9, %v178_v8  ;;  %v182_v14 = vld [vmem:[%s1126_s3 + $0x140] sm:$0xff]  ;;  %v184_v15 = vld [vmem:[%s1126_s3 + $0x150] sm:$0xff] }
  0x13   :  { %v639_v13 = vpack.c.bf16 %v185_v11, %v183_v10  ;;  %v187_v16 = vld [vmem:[%s1126_s3 + $0x168] sm:$0xff]  ;;  %v189_v17 = vld [vmem:[%s1126_s3 + $0x178] sm:$0xff]  ;;  %v641_v18 = vpack.c.bf16 %v184_v15, %v182_v14  ;;  %v186_v20 = vld [vmem:[%s1126_s3 + $0x160] sm:$0xff] }
  0x14   :  { %614 = vmatpush1.bf16.msra.mxu1 %v613_v40  ;;  %v643_v19 = vpack.c.bf16 %v189_v17, %v187_v16  ;;  %v188_v21 = vld [vmem:[%s1126_s3 + $0x170] sm:$0xff]  ;;  %v191_v22 = vld [vmem:[%s1126_s3 + $0x188] sm:$0xff]  ;;  %v193_v23 = vld [vmem:[%s1126_s3 + $0x198] sm:$0xff] }
  0x15   :  { %616 = vmatprep.subr.bf16.mxu1 %v615_v41  ;;  %v645_v24 = vpack.c.bf16 %v188_v21, %v186_v20  ;;  %v647_v25 = vpack.c.bf16 %v193_v23, %v191_v22  ;;  %v190_v26 = vld [vmem:[%s1126_s3 + $0x180] sm:$0xff]  ;;  %v192_v27 = vld [vmem:[%s1126_s3 + $0x190] sm:$0xff]  ;;  %v195_v28 = vld [vmem:[%s1126_s3 + $0x1a8] sm:$0xff]  ;;  %v44_v22 = vlaneseq }
  0x16   :  { %v197_v29 = vld [vmem:[%s1126_s3 + $0x1b8] sm:$0xff]  ;;  %v649_v30 = vpack.c.bf16 %v192_v27, %v190_v26  ;;  %v194_v32 = vld [vmem:[%s1126_s3 + $0x1a0] sm:$0xff]  ;;  %v196_v33 = vld [vmem:[%s1126_s3 + $0x1b0] sm:$0xff] }
  0x17   :  { %v651_v31 = vpack.c.bf16 %v197_v29, %v195_v28  ;;  %v199_v34 = vld [vmem:[%s1126_s3 + $0x1c8] sm:$0xff]  ;;  %v201_v35 = vld [vmem:[%s1126_s3 + $0x1d8] sm:$0xff]  ;;  %v653_v36 = vpack.c.bf16 %v196_v33, %v194_v32  ;;  %v198_v38 = vld [vmem:[%s1126_s3 + $0x1c0] sm:$0xff]  ;;  %v45_v23 = vshrl.u32 %v44_v22, 7 }
  0x18   :  { %618 = vmatpush1.bf16.msra.mxu1 %v617_v46  ;;  %v655_v37 = vpack.c.bf16 %v201_v35, %v199_v34  ;;  %v200_v39 = vld [vmem:[%s1126_s3 + $0x1d0] sm:$0xff]  ;;  %v203_v41 = vld [vmem:[%s1126_s3 + $0x1e8] sm:$0xff]  ;;  %v205_v42 = vld [vmem:[%s1126_s3 + $0x1f8] sm:$0xff] }
  0x19   :  { %620 = vmatprep.subr.bf16.mxu1 %v619_v47  ;;  %v657_v40 = vpack.c.bf16 %v200_v39, %v198_v38  ;;  %v659_v43 = vpack.c.bf16 %v205_v42, %v203_v41  ;;  %v202_v44 = vld [vmem:[%s1126_s3 + $0x1e0] sm:$0xff]  ;;  %v204_v45 = vld [vmem:[%s1126_s3 + $0x1f0] sm:$0xff]  ;;  %v316_v48 = vld [vmem:[%s1128_s5 + $0x88] sm:$0xff]  ;;  %v50_v26 = vsub.s32 1, %v45_v23 }
  0x1a   :  { %v661_v46 = vpack.c.bf16 %v204_v45, %v202_v44  ;;  %v315_v47 = vld [vmem:[%s1128_s5 + $0x80] sm:$0xff]  ;;  %v300_v51 = vld [vmem:[%s1128_s5 + $0x8] sm:$0xff]  ;;  %v301_v56 = vld [vmem:[%s1128_s5 + $0x10] sm:$0xff] }
  0x1b   :  { %v299_v49 = vld [vmem:[%s1128_s5] sm:$0xff]  ;;  %v663_v50 = vpack.c.bf16 %v316_v48, %v315_v47  ;;  %v302_v57 = vld [vmem:[%s1128_s5 + $0x18] sm:$0xff]  ;;  %v304_v63 = vld [vmem:[%s1128_s5 + $0x28] sm:$0xff] }
  0x1c   :  { %622 = vmatpush1.bf16.msra.mxu1 %v621_v52  ;;  %v317_v52 = vld [vmem:[%s1128_s5 + $0x90] sm:$0xff]  ;;  %v665_v54 = vpack.c.bf16 %v300_v51, %v299_v49  ;;  %v669_v60 = vpack.c.bf16 %v302_v57, %v301_v56  ;;  %v303_v62 = vld [vmem:[%s1128_s5 + $0x20] sm:$0xff]  ;;  %v306_v5 = vld [vmem:[%s1128_s5 + $0x38] sm:$0xff] }
  0x1d   :  { %624 = vmatprep.subr.bf16.mxu1 %v623_v53  ;;  %v318_v53 = vld [vmem:[%s1128_s5 + $0x98] sm:$0xff]  ;;  %664 = vmatprep.subr.bf16.mxu0 %v663_v50  ;;  %v673_v2 = vpack.c.bf16 %v304_v63, %v303_v62  ;;  %v305_v4 = vld [vmem:[%s1128_s5 + $0x30] sm:$0xff]  ;;  %v307_v10 = vld [vmem:[%s1128_s5 + $0x40] sm:$0xff] }
  0x1e   :  { %v667_v55 = vpack.c.bf16 %v318_v53, %v317_v52  ;;  %666 = vmatpush3.bf16.msra.mxu0 %v665_v54  ;;  %v677_v8 = vpack.c.bf16 %v306_v5, %v305_v4  ;;  %v308_v11 = vld [vmem:[%s1128_s5 + $0x48] sm:$0xff]  ;;  %v309_v16 = vld [vmem:[%s1128_s5 + $0x50] sm:$0xff]  ;;  %v310_v17 = vld [vmem:[%s1128_s5 + $0x58] sm:$0xff] }
  0x1f   :  { %v681_v14 = vpack.c.bf16 %v308_v11, %v307_v10  ;;  %v685_v20 = vpack.c.bf16 %v310_v17, %v309_v16  ;;  %v311_v41 = vld [vmem:[%s1128_s5 + $0x60] sm:$0xff]  ;;  %v312_v42 = vld [vmem:[%s1128_s5 + $0x68] sm:$0xff]  ;;  %v329_v44 = vld [vmem:[%s1128_s5 + $0xf0] sm:$0xff] }
  0x20   :  { %626 = vmatpush1.bf16.msra.mxu1 %v625_v58  ;;  %v319_v58 = vld [vmem:[%s1128_s5 + $0xa0] sm:$0xff]  ;;  %668 = vmatprep.subr.bf16.mxu0 %v667_v55  ;;  %v330_v45 = vld [vmem:[%s1128_s5 + $0xf8] sm:$0xff]  ;;  %v313_v47 = vld [vmem:[%s1128_s5 + $0x70] sm:$0xff] }
  0x21   :  { %628 = vmatprep.subr.bf16.mxu1 %v627_v59  ;;  %v320_v59 = vld [vmem:[%s1128_s5 + $0xa8] sm:$0xff]  ;;  %v314_v48 = vld [vmem:[%s1128_s5 + $0x78] sm:$0xff]  ;;  %v415_v50 = vld [vmem:[%s1130_s7] sm:$0xff] }
  0x22   :  { %v671_v61 = vpack.c.bf16 %v320_v59, %v319_v58  ;;  %670 = vmatpush3.bf16.msra.mxu0 %v669_v60  ;;  %v693_v49 = vpack.c.bf16 %v314_v48, %v313_v47  ;;  %v416_v51 = vld [vmem:[%s1130_s7 + $0x8] sm:$0xff]  ;;  %v206_v53 = vld [vmem:[%s1131_s4] sm:$0x3]  ;;  %v417_v4 = vld [vmem:[%s1130_s7 + $0x10] sm:$0xff] }
  0x23   :  { %v695_v52 = vpack.c.bf16 %v416_v51, %v415_v50  ;;  %v215_v55 = vrot.slane %v206_v53, %v50_v26  ;;  %v418_v5 = vld [vmem:[%s1130_s7 + $0x18] sm:$0xff]  ;;  %v421_v10 = vld [vmem:[%s1130_s7 + $0x30] sm:$0xff] }
  0x24   :  { %630 = vmatpush1.bf16.msra.mxu1 %v629_v0  ;;  %v321_v0 = vld [vmem:[%s1128_s5 + $0xb0] sm:$0xff]  ;;  %672 = vmatprep.subr.bf16.mxu0 %v671_v61  ;;  %v422_v11 = vld [vmem:[%s1130_s7 + $0x38] sm:$0xff] }
  0x25   :  { %632 = vmatprep.subr.bf16.mxu1 %v631_v1  ;;  %v322_v1 = vld [vmem:[%s1128_s5 + $0xb8] sm:$0xff] }
  0x26   :  { %v675_v3 = vpack.c.bf16 %v322_v1, %v321_v0  ;;  %674 = vmatpush3.bf16.msra.mxu0 %v673_v2 }
  0x28   :  { %634 = vmatpush1.bf16.msra.mxu1 %v633_v6  ;;  %v323_v6 = vld [vmem:[%s1128_s5 + $0xc0] sm:$0xff]  ;;  %676 = vmatprep.subr.bf16.mxu0 %v675_v3 }
  0x29   :  { %636 = vmatprep.subr.bf16.mxu1 %v635_v7  ;;  %v324_v7 = vld [vmem:[%s1128_s5 + $0xc8] sm:$0xff] }
  0x2a   :  { %v679_v9 = vpack.c.bf16 %v324_v7, %v323_v6  ;;  %678 = vmatpush3.bf16.msra.mxu0 %v677_v8  ;;  %v699_v6 = vpack.c.bf16 %v418_v5, %v417_v4  ;;  %v419_v7 = vld [vmem:[%s1130_s7 + $0x20] sm:$0xff]  ;;  %v420_v8 = vld [vmem:[%s1130_s7 + $0x28] sm:$0xff] }
  0x2c   :  { %638 = vmatpush1.bf16.msra.mxu1 %v637_v12  ;;  %v325_v12 = vld [vmem:[%s1128_s5 + $0xd0] sm:$0xff]  ;;  %680 = vmatprep.subr.bf16.mxu0 %v679_v9  ;;  %v703_v9 = vpack.c.bf16 %v420_v8, %v419_v7 }
  0x2d   :  { %640 = vmatprep.subr.bf16.mxu1 %v639_v13  ;;  %v326_v13 = vld [vmem:[%s1128_s5 + $0xd8] sm:$0xff] }
  0x2e   :  { %v683_v15 = vpack.c.bf16 %v326_v13, %v325_v12  ;;  %682 = vmatpush3.bf16.msra.mxu0 %v681_v14  ;;  %v707_v12 = vpack.c.bf16 %v422_v11, %v421_v10  ;;  %v520_v14 = vld [vmem:[%s1132_s6] ss:$0 sm:$0xff] }
  0x30   :  { %642 = vmatpush1.bf16.msra.mxu1 %v641_v18  ;;  %v327_v18 = vld [vmem:[%s1128_s5 + $0xe0] sm:$0xff]  ;;  %684 = vmatprep.subr.bf16.mxu0 %v683_v15 }
  0x31   :  { %644 = vmatprep.subr.bf16.mxu1 %v643_v19  ;;  %v328_v19 = vld [vmem:[%s1128_s5 + $0xe8] sm:$0xff] }
  0x32   :  { %v687_v21 = vpack.c.bf16 %v328_v19, %v327_v18  ;;  %686 = vmatpush3.bf16.msra.mxu0 %v685_v20 }
  0x34   :  { %646 = vmatpush1.bf16.msra.mxu1 %v645_v24  ;;  %688 = vmatprep.subr.bf16.mxu0 %v687_v21  ;;  %v46_v24 = vsub.s32 0, %v45_v23 }
  0x35   :  { %648 = vmatprep.subr.bf16.mxu1 %v647_v25  ;;  %v42_v25 = vld [vmem:[%s1129_s2] sm:$0x3] }
  0x36   :  { %v47_v27 = vrot.slane %v42_v25, %v46_v24  ;;  %v51_v28 = vrot.slane %v42_v25, %v50_v26  ;;  %v211_v54 = vrot.slane %v206_v53, %v46_v24  ;;  %v521_v24 = vld [vmem:[%s1133_s8] ss:$0 sm:$0xff] }
  0x38   :  { %650 = vmatpush1.bf16.msra.mxu1 %v649_v30 }
  0x39   :  { %652 = vmatprep.subr.bf16.mxu1 %v651_v31 }
  0x3c   :  { %654 = vmatpush1.bf16.msra.mxu1 %v653_v36 }
  0x3d   :  { %656 = vmatprep.subr.bf16.mxu1 %v655_v37 }
  0x40   :  { %658 = vmatpush1.bf16.msra.mxu1 %v657_v40 }
  0x41   :  { %660 = vmatprep.subr.bf16.mxu1 %v659_v43  ;;  %v689_v43 = vpack.c.bf16 %v312_v42, %v311_v41 }
  0x43   :  { %690 = vmatpush3.bf16.msra.mxu0 %v689_v43 }
  0x44   :  { %662 = vmatpush1.bf16.msra.mxu1 %v661_v46  ;;  %v691_v46 = vpack.c.bf16 %v330_v45, %v329_v44 }
  0x46   :  { %692 = vmatprep.subr.bf16.mxu0 %v691_v46 }
  0x47   :  { %694 = vmatpush3.bf16.msra.mxu0 %v693_v49 }
  0x48   :  { %696 = vmatprep.subr.bf16.mxu0 %v695_v52 }
  0xdf   :  { %v127_v29 = vpop.f32.mrb[0].mxu0 }
  0xe0   :  { %v128_v30 = vadd.f32 %v127_v29, %v47_v27  ;;  %v129_v31 = vpop.f32.mrb[1].mxu0 }
  0xe1   :  { %v130_v32 = vadd.f32 %v129_v31, %v51_v28 }
  0xe2   :  { %v138_v35 = vmax.f32 %v128_v30, 0.0 }
  0xe3   :  { %v133_v33 = vpop.f32.mrb[2].mxu0  ;;  %v139_v34 = vmax.f32 %v130_v32, 0.0 }
  0xe4   :  { %v134_v36 = vadd.f32 %v133_v33, %v47_v27  ;;  %v135_v37 = vpop.f32.mrb[3].mxu0 }
  0xe5   :  { %v136_v38 = vadd.f32 %v135_v37, %v51_v28  ;;  %282 = vmatprep.mubr.f32.mxu1 %v139_v34 }
  0xe6   :  { %283 = vmatmul.mubr.f32.vlgmr.msra.gmra.mrb[0].mxu1 %v138_v35  ;;  %v140_v40 = vmax.f32 %v134_v36, 0.0 }
  0xe7   :  { %v141_v39 = vmax.f32 %v136_v38, 0.0 }
  0xe9   :  { %288 = vmatprep.mubr.f32.mxu1 %v141_v39 }
  0xea   :  { %289 = vmatmul.mubr.f32.gmra.mrb[2].mxu1 %v140_v40 }
 0x1b9   :  { %v284_v56 = vpop.f32.mrb[0].mxu1 }
 0x1ba   :  { %v285_v57 = vadd.f32 %v284_v56, %v211_v54  ;;  %v286_v58 = vpop.f32.mrb[1].mxu1 }
 0x1bb   :  { %v287_v59 = vadd.f32 %v286_v58, %v215_v55 }
 0x1bc   :  { %v295_v62 = vmax.f32 %v285_v57, 0.0 }
 0x1bd   :  { %v296_v60 = vmax.f32 %v287_v59, 0.0  ;;  %v290_v61 = vpop.f32.mrb[2].mxu1 }
 0x1be   :  { %v291_v63 = vadd.f32 %v290_v61, %v211_v54  ;;  %v292_v0 = vpop.f32.mrb[3].mxu1 }
 0x1bf   :  { %v293_v1 = vadd.f32 %v292_v0, %v215_v55  ;;  %402 = vmatprep.mubr.f32.mxu0 %v296_v60 }
 0x1c0   :  { %403 = vmatmul.mubr.f32.vlgmr.msra.gmra.mrb[4].mxu0 %v295_v62  ;;  %v297_v3 = vmax.f32 %v291_v63, 0.0 }
 0x1c1   :  { %v298_v2 = vmax.f32 %v293_v1, 0.0  ;;  %698 = vmatpush3.bf16.msra.mxu0 %v695_v52 }
 0x1c2   :  { %700 = vmatprep.subr.bf16.mxu0 %v699_v6 }
 0x1c3   :  { %407 = vmatprep.mubr.f32.mxu0 %v298_v2 }
 0x1c4   :  { %408 = vmatmul.mubr.f32.gmra.mrb[6].mxu0 %v297_v3 }
 0x1c5   :  { %702 = vmatpush3.bf16.msra.mxu0 %v699_v6 }
 0x1c6   :  { %704 = vmatprep.subr.bf16.mxu0 %v703_v9 }
 0x1c9   :  { %706 = vmatpush3.bf16.msra.mxu0 %v703_v9 }
 0x1ca   :  { %708 = vmatprep.subr.bf16.mxu0 %v707_v12 }
 0x1cd   :  { %710 = vmatpush3.bf16.msra.mxu0 %v707_v12 }
 0x293   :  { %v556_v13 = vpop.f32.mrb[4].mxu0 }
 0x294   :  { %v557_v15 = vpop.f32.mrb[5].mxu0 }
 0x295   :  { %v558_v16 = vadd.f32 %v557_v15, %v556_v13 }
 0x297   :  { %v405_v17 = vadd.f32 %v558_v16, %v520_v14  ;;  %v559_v18 = vpop.f32.mrb[6].mxu0 }
 0x298   :  { %v560_v19 = vpop.f32.mrb[7].mxu0 }
 0x299   :  { %v413_v20 = vmax.f32 %v405_v17, 0.0  ;;  %v561_v21 = vadd.f32 %v560_v19, %v559_v18 }
 0x29b   :  { %v410_v22 = vadd.f32 %v561_v21, %v520_v14  ;;  %588 = vmatprep.mubr.msk.f32.mxu0 %vm430_vm1, %v413_v20 }
 0x29d   :  { %v414_v23 = vmax.f32 %v410_v22, 0.0 }
 0x29f   :  { %589 = vmatmul.mubr.msk.f32.vlgmr.msra.gmra.mrb[8].mxu0 %vm430_vm1, %v414_v23 }
 0x372   :  { %v590_v25 = vpop.f32.mrb[8].mxu0 }
 0x373   :  { %v509_v26 = vadd.f32 %v590_v25, %v521_v24  ;;  %v503_v27 = vpop.f32.mrb[9].mxu0 }
 0x374   :  { %v504_v28 = vadd.f32 %v521_v24, %v503_v27 }
 0x375   :  { %513 = vst [vmem:[%s1134_s9 + $0x8] sm:$0xff] %v509_v26 }
 0x376   :  { %512 = vst [vmem:[%s1134_s9] sm:$0xff] %v504_v28 }

</bundles_post_ra>
